<compile_context>
chip_gen: v5e
topology: v5e:2x2
jax: 0.10.0
libtpu: 0.0.40
codegen_flags: <defaults>
</compile_context>

<pallas_src>
import jax
import jax.numpy as jnp
from jax.experimental import pallas as pl
from jax.experimental.pallas import tpu as pltpu


def _color_fusion_kernel(w_ref, base_ref, expert_ref, out_ref):
    # w_ref:      (1,  W)  f32 fused-channel weights (VMEM-resident across grid)
    # base_ref:   (TB, W)  row tile of base color predictions
    # expert_ref: (TB, W)  row tile of expert color predictions
    # out_ref:    (TB, W)  fused output tile
    w = w_ref[...].astype(jnp.float32)
    base = base_ref[...].astype(jnp.float32)
    expert = expert_ref[...].astype(jnp.float32)
    # out = w*base + (1-w)*expert, written FMA-style: one fewer vmul, no (1-w).
    out_ref[...] = (expert + w * (base - expert)).astype(out_ref.dtype)


def _sublane_multiple(itemsize):
    # f32 -> 8 rows per sublane tile, bf16 -> 16, int8/fp8 -> 32.
    return max(8, 32 // max(int(itemsize), 1))


def _pick_row_tile(B, W, itemsizes, target_rows=2048, stream_budget_bytes=24 << 20):
    """Row tile: multiple of the dtype sublane packing, <= target_rows, with the
    double-buffered streamed footprint (base + expert + out) under a budget that
    is conservative for v7x's 64 MiB VMEM and v5e's 16 MiB default scoped limit."""
    sub = max(_sublane_multiple(s) for s in itemsizes)
    bytes_per_row = 2 * W * sum(int(s) for s in itemsizes)  # 2 pipeline buffers each
    cap = max(sub, stream_budget_bytes // max(bytes_per_row, 1))
    tb = max((min(target_rows, cap) // sub) * sub, sub)
    if B <= tb:
        # Whole batch fits in one tile: split into (at least) two grid steps so
        # both TensorCores get work on v7x.  For B <= sub this degenerates back
        # to a single step, which is fine (too small to matter).
        half = -(-B // 2)
        tb = max(((half + sub - 1) // sub) * sub, sub)
    return tb


def color_model_simple_forward(weights, preds_semantics_base,
                               preds_color_base, preds_color_expert):
    """weights: (3, NB) f32 parameter; preds_color_*: (B, 3, NB)."""
    B, C, NB = preds_color_base.shape
    assert C == 3 and weights.shape == (3, NB)
    assert preds_color_expert.shape == (B, C, NB)
    W = C * NB
    # NOTE: with NB a multiple of 128, W is lane-dense (full-width unmasked vst).
    # Other bin counts still run correctly but with masked partial stores; pad NB
    # to a multiple of 128 at the prediction producer if that matters.

    out_dtype = jnp.result_type(weights.dtype, preds_color_base.dtype,
                                preds_color_expert.dtype)
    out_itemsize = jnp.dtype(out_dtype).itemsize

    # Tiny-input fast path: custom-call overhead dominates below ~256 KB.
    if B * W * out_itemsize < (256 << 10):
        w = weights[None].astype(jnp.float32)
        base = preds_color_base.astype(jnp.float32)
        expert = preds_color_expert.astype(jnp.float32)
        fused = (expert + w * (base - expert)).astype(out_dtype)
        return preds_semantics_base, fused

    # Lane-dense 2D views (free: row-major contiguous reshape).
    base2d = preds_color_base.reshape(B, W)
    expert2d = preds_color_expert.reshape(B, W)
    w2d = weights.astype(jnp.float32).reshape(1, W)   # keep params in f32

    itemsizes = (jnp.dtype(preds_color_base.dtype).itemsize,
                 jnp.dtype(preds_color_expert.dtype).itemsize,
                 out_itemsize)
    tb = _pick_row_tile(B, W, itemsizes)
    num_tiles = pl.cdiv(B, tb)        # no padding: boundary block writes are masked

    # Explicit scoped-VMEM limit sized from actual usage (+ headroom), clamped to
    # [16 MiB, 30 MiB] so it never shrinks below a chip default nor crowds v7x.
    stream_vmem = 2 * tb * W * sum(int(s) for s in itemsizes)
    w_vmem = 2 * W * 4
    vmem_limit_bytes = int(min(max(stream_vmem + w_vmem + (4 << 20), 16 << 20),
                               30 << 20))

    fused2d = pl.pallas_call(
        _color_fusion_kernel,
        out_shape=jax.ShapeDtypeStruct((B, W), out_dtype),
        grid_spec=pl.GridSpec(
            grid=(num_tiles,),
            in_specs=[
                pl.BlockSpec((1, W), lambda i: (0, 0)),    # weights, VMEM-resident
                pl.BlockSpec((tb, W), lambda i: (i, 0)),   # base row tile
                pl.BlockSpec((tb, W), lambda i: (i, 0)),   # expert row tile
            ],
            out_specs=pl.BlockSpec((tb, W), lambda i: (i, 0)),
        ),
        compiler_params=pltpu.CompilerParams(
            dimension_semantics=("parallel",),
            vmem_limit_bytes=vmem_limit_bytes),
    )(w2d, base2d, expert2d)

    fused = fused2d.reshape(B, C, NB)

    # preds_semantics_base is returned untouched, exactly as in the nn.Module.
    return preds_semantics_base, fused


if __name__ == "__main__":
    key = jax.random.PRNGKey(0)
    k1, k2, k3, k4, k5 = jax.random.split(key, 5)

    NUM_BINS = 128
    # Parameter init matches nn.Parameter(torch.full((3, num_bins), 0.5)).
    weights = jnp.full((3, NUM_BINS), 0.5, dtype=jnp.float32)

    def ref_fusion(w, base, expert):
        return w[None] * base + (1.0 - w[None]) * expert

    # Case 1: small batch (typical module call) -> fused-jnp fast path.
    B0 = 2
    sem0 = jax.random.normal(k1, (B0, 4, 16, 16), dtype=jnp.float32)
    base0 = jax.random.normal(k2, (B0, 3, NUM_BINS), dtype=jnp.float32)
    exp0 = jax.random.normal(k3, (B0, 3, NUM_BINS), dtype=jnp.float32)
    s0, c0 = color_model_simple_forward(weights, sem0, base0, exp0)
    jax.block_until_ready((s0, c0))
    assert jnp.allclose(c0, ref_fusion(weights, base0, exp0), atol=1e-6)
    assert jnp.array_equal(s0, sem0)

    # Case 2: batch large enough for the Pallas path, with B not divisible by the
    # row tile -> exercises masked boundary-block writeback (no pad / slice).
    B1 = 300
    sem1 = jax.random.normal(k1, (B1, 4, 16, 16), dtype=jnp.float32)
    base1 = jax.random.normal(k4, (B1, 3, NUM_BINS), dtype=jnp.float32)
    exp1 = jax.random.normal(k5, (B1, 3, NUM_BINS), dtype=jnp.float32)
    s1, c1 = color_model_simple_forward(weights, sem1, base1, exp1)
    jax.block_until_ready((s1, c1))
    assert jnp.allclose(c1, ref_fusion(weights, base1, exp1), atol=1e-6)
    assert jnp.array_equal(s1, sem1)

    print("KERNEL_OK")
</pallas_src>

<mosaic_0001>
module attributes {stable_mosaic.version = 11 : i64} {
  func.func @_color_fusion_kernel(%arg0: i32, %arg1: memref<1x384xf32, #tpu.memory_space<vmem>>, %arg2: memref<152x384xf32, #tpu.memory_space<vmem>>, %arg3: memref<152x384xf32, #tpu.memory_space<vmem>>, %arg4: memref<152x384xf32, #tpu.memory_space<vmem>>) attributes {dimension_semantics = [#tpu.dimension_semantics<parallel>], iteration_bounds = array<i64: 2>, scalar_prefetch = 0 : i64, scratch_operands = 0 : i64, tpu.core_type = #tpu.core_type<tc>, window_params = [{pipeline_mode = #tpu.pipeline_mode<synchronous>, transform_indices = @transform_0, window_bounds = array<i64: 1, 384>}, {transform_indices = @transform_1, window_bounds = array<i64: 152, 384>}, {transform_indices = @transform_2, window_bounds = array<i64: 152, 384>}, {transform_indices = @transform_3, window_bounds = array<i64: 152, 384>}]} {
    %c0 = arith.constant 0 : index
    %c0_0 = arith.constant 0 : index
    %0 = vector.load %arg1[%c0, %c0_0] : memref<1x384xf32, #tpu.memory_space<vmem>>, vector<1x384xf32>
    %c0_1 = arith.constant 0 : index
    %c0_2 = arith.constant 0 : index
    %1 = vector.load %arg2[%c0_1, %c0_2] : memref<152x384xf32, #tpu.memory_space<vmem>>, vector<152x384xf32>
    %c0_3 = arith.constant 0 : index
    %c0_4 = arith.constant 0 : index
    %2 = vector.load %arg3[%c0_3, %c0_4] : memref<152x384xf32, #tpu.memory_space<vmem>>, vector<152x384xf32>
    %3 = arith.subf %1, %2 : vector<152x384xf32>
    %4 = vector.broadcast %0 : vector<1x384xf32> to vector<152x384xf32>
    %5 = arith.mulf %4, %3 : vector<152x384xf32>
    %6 = arith.addf %2, %5 : vector<152x384xf32>
    %c0_5 = arith.constant 0 : index
    %c0_6 = arith.constant 0 : index
    %7 = vector.load %arg4[%c0_5, %c0_6] : memref<152x384xf32, #tpu.memory_space<vmem>>, vector<152x384xf32>
    tpu.vector_store %arg4[%c0_5, %c0_6], %6 {strides = array<i32>} : memref<152x384xf32, #tpu.memory_space<vmem>>, vector<152x384xf32>,
    return
  }
  func.func @transform_0(%arg0: i32) -> (i32, i32) {
    %c0_i32 = arith.constant 0 : i32
    %c0_i32_0 = arith.constant 0 : i32
    %c0_i32_1 = arith.constant 0 : i32
    return %c0_i32, %c0_i32_0 : i32, i32
  }
  func.func @transform_1(%arg0: i32) -> (i32, i32) {
    %c0_i32 = arith.constant 0 : i32
    %c0_i32_0 = arith.constant 0 : i32
    return %arg0, %c0_i32 : i32, i32
  }
  func.func @transform_2(%arg0: i32) -> (i32, i32) {
    %c0_i32 = arith.constant 0 : i32
    %c0_i32_0 = arith.constant 0 : i32
    return %arg0, %c0_i32 : i32, i32
  }
  func.func @transform_3(%arg0: i32) -> (i32, i32) {
    %c0_i32 = arith.constant 0 : i32
    %c0_i32_0 = arith.constant 0 : i32
    return %arg0, %c0_i32 : i32, i32
  }
}

</mosaic_0001>

<bundles_post_ra>
// kernel: tpu_custom_call.1
= control target key start
LH: loop header
LB: loop body
LE: loop exit
PB: predicated region body
PF: predicated region fallthrough
CT: control target
= control target key end

     0   :  { %8 = vsyncpa [#allocation3], 0  ;;  %s1427_s0 = inlined_call_operand.hbm [shape: f32[1,384], index: 0, kind: input, shape index: {}]   ;;  %s1428_s1 = inlined_call_operand.hbm [shape: f32[300,384], index: 1, kind: input, shape index: {}]   ;;  %s1429_s2 = inlined_call_operand.hbm [shape: f32[300,384], index: 2, kind: input, shape index: {}]   ;;  %s1430_s3 = inlined_call_operand.hbm [shape: f32[300,384], index: 3, kind: output, shape index: {}]  }
   0x1   :  { %9 = vsyncpa [#allocation6], 0 }
   0x2   :  { %11 = vsyncpa [#allocation6 + $0x1], 0 }
   0x3   :  { %12 = vsyncpa [#allocation4], 0 }
   0x4   :  { %14 = vsyncpa [#allocation4 + $0x1], 0  ;;  %s995_s12 = smov 0   ;;  %s997_s13 = smov 0  }
   0x5   :  { %s999_s14 = smov 0   ;;  %s1001_s15 = smov 0  }
   0x6 LB: > { %s1016_s16 = sadd.s32 1, %s968_s15   ;;  %s48_s17 = sadd.s32 1, %s964_s14  ;;  %s968_s15 = sphi %s1001_s15, %s1447_s15   ;;  %s964_s14 = sphi %s999_s14, %s1446_s14   ;;  %s960_s13 = sphi %s997_s13, %s1445_s13   ;;  %s956_s12 = sphi %s995_s12, %s1444_s12  }
   0x7   : > { %s45_s18 = ssub.s32 %s968_s15, %s1016_s16  ;;  %p55_p0 = scmp.ne.s32.totalorder %s964_s14, %s960_s13 }
   0x8   : > { %p46_p1 = scmp.eq.s32.totalorder %s45_s18, 0  ;;  %p56_p2 = scmp.eq.s32.totalorder %s968_s15, 0 }
   0x9   : > { %p765_p4 = scmp.lt.s32.totalorder %s968_s15, 2  ;;  %s149_s20 = sand.u32 1, %s968_s15  }
   0xa   : > { %s1027_s19 = scalar_select %p46_p1, %s964_s14, %s48_s17  }
   0xb   : > { %p57_p5 = por %p56_p2, %p55_p0  ;;  %s151_s21 = sand.u32 1, %s964_s14  }
   0xc   : > { %s1034_s22 = smul.u32 456, %s151_s21  ;;  %s1047_s4 = scalar_lea.sflag [#allocation6], %s149_s20 }
   0xd   : > { %p1036_p6 = pnand %p765_p4, %p57_p5  ;;  %s766_s24 = smul.u32 456, %s968_s15 }
   0xe   : > { %s153_s25 = scalar_lea.vmem [#allocation5], %s1034_s22  ;;  %s815_s9 = scalar_lea.hbm %s1428_s1, 912 }
   0xf   : > { %s162_s26 = sshll.u32 %s153_s25, 4  ;;  %s159_s29 = scalar_lea.hbm %s1428_s1, %s766_s24  ;;  %s163_s26 = int_to_ptr.vmem [resolvable:$true] %s162_s26 }
  0x10   : > { %s160_s30 = sshll.u32 %s159_s29, 4  ;;  %p812_p8 = pneg %p1036_p6  ;;  %s161_s30 = int_to_ptr.hbm [resolvable:$true] %s160_s30 }
  0x11   : > { %s808_s5 = sshra.s32 %s161_s30, 4  ;;  %s809_s5 = int_to_ptr.hbm [resolvable:$true] %s808_s5 }
  0x12   : > { %s810_s6 = scalar_lea.hbm %s809_s5, 456  ;;  %p816_p11 = scmp.lt.s32.totalorder %s809_s5, %s1428_s1 }
  0x13   : > { %p811_p7 = scmp.ne.s32.totalorder %s809_s5, %s810_s6  ;;  %p817_p12 = scmp.lt.s32.totalorder %s815_s9, %s810_s6 }
  0x15   : > { %p813_p9 = pnand %p812_p8, %p811_p7  ;;  %p818_p13 = por %p817_p12, %p816_p11 }
  0x17   : > { %p814_p10 = pneg %p813_p9 }
  0x19   : > { %p819_p1 = pnand %p818_p13, %p814_p10 }
  0x1b   : > { %822 = shalt.err (!%p819_p1)
}
  0x1c   : > { %s1431_s17 = smov 384   ;;  %s1432_s18 = smov 24  }
  0x1d   : > { %756 = dma.hbm_to_vmem [thread:$0]  (!%p1036_p6), %s161_s30, 7296, %s163_s26, %s1047_s4, %s1431_s17, %s1431_s17, %s1432_s18  }
  0x1e   : > { %s1067_s20 = sadd.s32 4294967295, %s968_s15   ;;  %s722_s21 = sadd.s32 4294967294, %s968_s15  }
  0x1f   : > { %p61_p2 = scmp.ne.s32.totalorder %s960_s13, %s956_s12  ;;  %p1433_p4 = scmp.eq.s32.totalorder %s1067_s20, 0 }
  0x20   : > { %p111_p5 = scmp.eq.s32.totalorder %s1067_s20, 1  ;;  %p117_p7 = scmp.eq.s32.totalorder %s722_s21, 1 }
  0x21   : > { %p723_p9 = scmp.ge.s32.totalorder %s968_s15, 1  ;;  %p1077_p10 = por %p1433_p4, %p61_p2 }
  0x22   : > { %p1084_p11 = por %p111_p5, %p55_p0  ;;  %p1088_p12 = por %p117_p7, %p61_p2 }
  0x23   : > { %p124_p13 = scmp.lt.s32.totalorder %s968_s15, 3  ;;  %s136_s30 = sshll.u32 %s1427_s0, 4  ;;  %s137_s30 = int_to_ptr.hbm [resolvable:$true] %s136_s30 }
  0x24   : > { %s972_s6 = smov [#allocation2]   ;;  %s182_s10 = scalar_lea.hbm %s1429_s2, %s766_s24 }
  0x25   : > { %p1096_p1 = pnand %p723_p9, %p124_p13  ;;  %s138_s7 = sshll.u32 %s972_s6, 4  ;;  %s139_s7 = int_to_ptr.vmem [resolvable:$true] %s138_s7 }
  0x26   : > { %s183_s11 = sshll.u32 %s182_s10, 4  ;;  %s176_s21 = scalar_lea.vmem [#allocation7], %s1034_s22  ;;  %s184_s11 = int_to_ptr.hbm [resolvable:$true] %s183_s11 }
  0x27   : > { %p749_p0 = pneg %p1096_p1  ;;  %s185_s28 = sshll.u32 %s176_s21, 4  ;;  %s186_s28 = int_to_ptr.vmem [resolvable:$true] %s185_s28 }
  0x28   : > { %s868_s29 = sshra.s32 %s184_s11, 4  ;;  %s875_s24 = scalar_lea.hbm %s1429_s2, 912  ;;  %s869_s29 = int_to_ptr.hbm [resolvable:$true] %s868_s29 }
  0x29   : > { %p750_p2 = pnand %p749_p0, %p1433_p4  ;;  %s870_s17 = scalar_lea.hbm %s869_s29, 456 }
  0x2a   : > { %p871_p5 = scmp.ne.s32.totalorder %s869_s29, %s870_s17  ;;  %p876_p13 = scmp.lt.s32.totalorder %s869_s29, %s1429_s2 }
  0x2b   : > { %752 = dma.hbm_to_vmem [thread:$0]  (!%p750_p2), %s137_s30, 48, %s139_s7, [#allocation3]  }
  0x2c   : > { %p873_p7 = pnand %p871_p5, %p812_p8  ;;  %p877_p0 = scmp.lt.s32.totalorder %s875_s24, %s870_s17 }
  0x2e   : > { %p874_p9 = pneg %p873_p7  ;;  %p878_p3 = por %p877_p0, %p876_p13 }
  0x30   : > { %p879_p4 = pnand %p878_p3, %p874_p9 }
  0x32   : > { %882 = shalt.err (!%p879_p4)
}
  0x33   : > { %s1439_s22 = smov 24   ;;  %s1440_s30 = smov 384  }
  0x34   : > { %759 = dma.hbm_to_vmem [thread:$0]  (!%p1036_p6), %s184_s11, 7296, %s186_s28, %s1047_s4, %s1440_s30, %s1440_s30, %s1439_s22  }
  0x35   : > { %197 = sbr.rel (%p1096_p1) target bundleno = 132 (0x84), region = 32  ;;  %p1441_p8 = scmp.eq.s32.totalorder (!%p1096_p1), %s1067_s20, 0 }
  0x3a   : > { %943 = dma.done.wait (%p1441_p8), [#allocation3], 48   ;;  %p1442_p2 = pmov %p1441_p8 }
  0x3b   : > { %s204_s17 = sand.u32 1, %s1067_s20   ;;  %s206_s23 = sand.u32 1, %s960_s13  }
  0x3c   : > { %945 = vsyncadd (%p1442_p2), [#allocation3], 4294967248  ;;  %s1135_s18 = smul.u32 456, %s206_s23  ;;  %s205_s4 = scalar_lea.sflag [#allocation6], %s204_s17 }
  0x3e   : > { %s1138_s7 = scalar_lea.vmem [#allocation5], %s1135_s18 }
  0x3f   : > { %947 = dma.done.wait (%p1077_p10), %s205_s4, 14592  }
  0x40   : > { %949 = vsyncadd (%p1077_p10), %s205_s4, 4294952704  ;;  %v250_v0 = vld [vmem:[#allocation2] sm:$0x7]  ;;  %v251_v1 = vld [vmem:[%s1138_s7] sm:$0xff]  ;;  %s1146_s5 = scalar_lea.vmem [#allocation7], %s1135_s18  ;;  %s1179_s25 = scalar_lea.vmem [#allocation8], %s1135_s18 }
  0x41   : > { %v308_v2 = vld [vmem:[%s1146_s5] sm:$0xff]  ;;  %v1149_v4 = vperm.slane %v250_v0, 0  ;;  %v252_v5 = vld [vmem:[%s1138_s7 + $0x8] sm:$0xff]  ;;  %v309_v6 = vld [vmem:[%s1146_s5 + $0x8] sm:$0xff]  ;;  %v1153_v7 = vperm.slane %v250_v0, 1  ;;  %v1156_v9 = vperm.slane %v250_v0, 2 }
  0x42   : > { %v365_v3 = vsub.f32 %v251_v1, %v308_v2  ;;  %v253_v8 = vld [vmem:[%s1138_s7 + $0x10] sm:$0xff]  ;;  %v366_v10 = vsub.f32 %v252_v5, %v309_v6  ;;  %v310_v11 = vld [vmem:[%s1146_s5 + $0x10] sm:$0xff]  ;;  %v254_v12 = vld [vmem:[%s1138_s7 + $0x18] sm:$0xff]  ;;  %s769_s10 = smul.u32 456, %s1067_s20  ;;  %s614_s28 = sshll.u32 %s1179_s25, 4  ;;  %s615_s28 = int_to_ptr.vmem [resolvable:$true] %s614_s28 }
  0x43   : > { %v311_v13 = vld [vmem:[%s1146_s5 + $0x18] sm:$0xff]  ;;  %v367_v15 = vsub.f32 %v253_v8, %v310_v11  ;;  %v255_v17 = vld [vmem:[%s1138_s7 + $0x20] sm:$0xff]  ;;  %v312_v18 = vld [vmem:[%s1146_s5 + $0x20] sm:$0xff]  ;;  %s601_s6 = scalar_lea.sflag [#allocation4], %s206_s23  ;;  %s918_s30 = scalar_lea.hbm %s1430_s3, 912 }
  0x44   : > { %v429_v14 = vmul.f32 %v1149_v4, %v365_v3  ;;  %v368_v16 = vsub.f32 %v254_v12, %v311_v13  ;;  %v256_v19 = vld [vmem:[%s1138_s7 + $0x28] sm:$0xff]  ;;  %v430_v20 = vmul.f32 %v1153_v7, %v366_v10  ;;  %v369_v21 = vsub.f32 %v255_v17, %v312_v18  ;;  %v313_v22 = vld [vmem:[%s1146_s5 + $0x28] sm:$0xff]  ;;  %v257_v23 = vld [vmem:[%s1138_s7 + $0x30] sm:$0xff]  ;;  %s613_s21 = scalar_lea.hbm %s1430_s3, %s769_s10 }
  0x45   : > { %v314_v24 = vld [vmem:[%s1146_s5 + $0x30] sm:$0xff]  ;;  %v431_v26 = vmul.f32 %v1156_v9, %v367_v15  ;;  %v370_v28 = vsub.f32 %v256_v19, %v313_v22  ;;  %v258_v29 = vld [vmem:[%s1138_s7 + $0x38] sm:$0xff]  ;;  %v315_v30 = vld [vmem:[%s1146_s5 + $0x38] sm:$0xff]  ;;  %s616_s29 = sshll.u32 %s613_s21, 4  ;;  %s617_s29 = int_to_ptr.hbm [resolvable:$true] %s616_s29 }
  0x46   : > { %v486_v25 = vadd.f32 %v429_v14, %v308_v2  ;;  %v432_v27 = vmul.f32 %v1149_v4, %v368_v16  ;;  %v259_v31 = vld [vmem:[%s1138_s7 + $0x40] sm:$0xff]  ;;  %v487_v32 = vadd.f32 %v430_v20, %v309_v6  ;;  %v433_v33 = vmul.f32 %v1153_v7, %v369_v21  ;;  %v316_v36 = vld [vmem:[%s1146_s5 + $0x40] sm:$0xff]  ;;  %v260_v37 = vld [vmem:[%s1138_s7 + $0x48] sm:$0xff]  ;;  %s912_s24 = sshra.s32 %s617_s29, 4  ;;  %s913_s24 = int_to_ptr.hbm [resolvable:$true] %s912_s24 }
  0x47   : > { %v371_v34 = vsub.f32 %v257_v23, %v314_v24  ;;  %v372_v35 = vsub.f32 %v258_v29, %v315_v30  ;;  %v317_v38 = vld [vmem:[%s1146_s5 + $0x48] sm:$0xff]  ;;  %v488_v39 = vadd.f32 %v431_v26, %v310_v11  ;;  %v434_v41 = vmul.f32 %v1156_v9, %v370_v28  ;;  %v261_v43 = vld [vmem:[%s1138_s7 + $0x50] sm:$0xff]  ;;  %v318_v44 = vld [vmem:[%s1146_s5 + $0x50] sm:$0xff]  ;;  %s914_s8 = scalar_lea.hbm %s913_s24, 456  ;;  %p919_p10 = scmp.lt.s32.totalorder %s913_s24, %s1430_s3 }
  0x48   : > { %543 = vst [vmem:[%s1179_s25] sm:$0xff] %v486_v25  ;;  %v489_v40 = vadd.f32 %v432_v27, %v311_v13  ;;  %v373_v42 = vsub.f32 %v259_v31, %v316_v36  ;;  %v262_v45 = vld [vmem:[%s1138_s7 + $0x58] sm:$0xff]  ;;  %v490_v46 = vadd.f32 %v433_v33, %v312_v18  ;;  %v374_v49 = vsub.f32 %v260_v37, %v317_v38  ;;  %v319_v50 = vld [vmem:[%s1146_s5 + $0x58] sm:$0xff]  ;;  %v263_v51 = vld [vmem:[%s1138_s7 + $0x60] sm:$0xff]  ;;  %p915_p3 = scmp.ne.s32.totalorder %s913_s24, %s914_s8  ;;  %p920_p1 = scmp.lt.s32.totalorder %s918_s30, %s914_s8 }
  0x49   : > { %544 = vst [vmem:[%s1179_s25 + $0x8] sm:$0xff] %v487_v32  ;;  %v435_v47 = vmul.f32 %v1149_v4, %v371_v34  ;;  %v436_v48 = vmul.f32 %v1153_v7, %v372_v35  ;;  %v320_v52 = vld [vmem:[%s1146_s5 + $0x60] sm:$0xff]  ;;  %v491_v53 = vadd.f32 %v434_v41, %v313_v22  ;;  %v375_v55 = vsub.f32 %v261_v43, %v318_v44  ;;  %v264_v57 = vld [vmem:[%s1138_s7 + $0x68] sm:$0xff]  ;;  %v321_v58 = vld [vmem:[%s1146_s5 + $0x68] sm:$0xff] }
  0x4a   : > { %545 = vst [vmem:[%s1179_s25 + $0x10] sm:$0xff] %v488_v39  ;;  %v437_v54 = vmul.f32 %v1156_v9, %v373_v42  ;;  %v376_v56 = vsub.f32 %v262_v45, %v319_v50  ;;  %v265_v59 = vld [vmem:[%s1138_s7 + $0x70] sm:$0xff]  ;;  %v438_v62 = vmul.f32 %v1149_v4, %v374_v49  ;;  %v377_v63 = vsub.f32 %v263_v51, %v320_v52  ;;  %v322_v0 = vld [vmem:[%s1146_s5 + $0x70] sm:$0xff]  ;;  %v266_v1 = vld [vmem:[%s1138_s7 + $0x78] sm:$0xff]  ;;  %p916_p6 = pnand %p915_p3, %p1084_p11  ;;  %p921_p5 = por %p920_p1, %p919_p10 }
  0x4b   : > { %546 = vst [vmem:[%s1179_s25 + $0x18] sm:$0xff] %v489_v40  ;;  %v492_v60 = vadd.f32 %v435_v47, %v314_v24  ;;  %v493_v61 = vadd.f32 %v436_v48, %v315_v30  ;;  %v323_v2 = vld [vmem:[%s1146_s5 + $0x78] sm:$0xff]  ;;  %v439_v5 = vmul.f32 %v1153_v7, %v375_v55  ;;  %v378_v8 = vsub.f32 %v264_v57, %v321_v58  ;;  %v267_v10 = vld [vmem:[%s1138_s7 + $0x80] sm:$0xff]  ;;  %v324_v11 = vld [vmem:[%s1146_s5 + $0x80] sm:$0xff] }
  0x4c   : > { %547 = vst [vmem:[%s1179_s25 + $0x20] sm:$0xff] %v490_v46  ;;  %v494_v3 = vadd.f32 %v437_v54, %v316_v36  ;;  %v440_v6 = vmul.f32 %v1156_v9, %v376_v56  ;;  %v268_v12 = vld [vmem:[%s1138_s7 + $0x88] sm:$0xff]  ;;  %v495_v13 = vadd.f32 %v438_v62, %v317_v38  ;;  %v441_v14 = vmul.f32 %v1149_v4, %v377_v63  ;;  %v325_v17 = vld [vmem:[%s1146_s5 + $0x88] sm:$0xff]  ;;  %v269_v18 = vld [vmem:[%s1138_s7 + $0x90] sm:$0xff]  ;;  %p917_p4 = pneg %p916_p6 }
  0x4d   : > { %548 = vst [vmem:[%s1179_s25 + $0x28] sm:$0xff] %v491_v53  ;;  %v379_v15 = vsub.f32 %v265_v59, %v322_v0  ;;  %v380_v16 = vsub.f32 %v266_v1, %v323_v2  ;;  %v326_v19 = vld [vmem:[%s1146_s5 + $0x90] sm:$0xff]  ;;  %v496_v20 = vadd.f32 %v439_v5, %v318_v44  ;;  %v442_v21 = vmul.f32 %v1153_v7, %v378_v8  ;;  %v270_v23 = vld [vmem:[%s1138_s7 + $0x98] sm:$0xff]  ;;  %v327_v24 = vld [vmem:[%s1146_s5 + $0x98] sm:$0xff] }
  0x4e   : > { %549 = vst [vmem:[%s1179_s25 + $0x30] sm:$0xff] %v492_v60  ;;  %v381_v22 = vsub.f32 %v267_v10, %v324_v11  ;;  %v271_v25 = vld [vmem:[%s1138_s7 + $0xa0] sm:$0xff]  ;;  %v497_v26 = vadd.f32 %v440_v6, %v319_v50  ;;  %v382_v29 = vsub.f32 %v268_v12, %v325_v17  ;;  %v328_v30 = vld [vmem:[%s1146_s5 + $0xa0] sm:$0xff]  ;;  %v272_v31 = vld [vmem:[%s1138_s7 + $0xa8] sm:$0xff]  ;;  %v498_v33 = vadd.f32 %v441_v14, %v320_v52  ;;  %p922_p7 = pnand %p921_p5, %p917_p4 }
  0x4f   : > { %550 = vst [vmem:[%s1179_s25 + $0x38] sm:$0xff] %v493_v61  ;;  %v443_v27 = vmul.f32 %v1156_v9, %v379_v15  ;;  %v444_v28 = vmul.f32 %v1149_v4, %v380_v16  ;;  %v329_v32 = vld [vmem:[%s1146_s5 + $0xa8] sm:$0xff]  ;;  %v383_v35 = vsub.f32 %v269_v18, %v326_v19  ;;  %v384_v36 = vsub.f32 %v270_v23, %v327_v24  ;;  %v273_v37 = vld [vmem:[%s1138_s7 + $0xb0] sm:$0xff]  ;;  %v330_v38 = vld [vmem:[%s1146_s5 + $0xb0] sm:$0xff] }
  0x50   : > { %551 = vst [vmem:[%s1179_s25 + $0x40] sm:$0xff] %v494_v3  ;;  %v445_v34 = vmul.f32 %v1153_v7, %v381_v22  ;;  %v274_v39 = vld [vmem:[%s1138_s7 + $0xb8] sm:$0xff]  ;;  %v499_v40 = vadd.f32 %v442_v21, %v321_v58  ;;  %v446_v41 = vmul.f32 %v1156_v9, %v382_v29  ;;  %v385_v42 = vsub.f32 %v271_v25, %v328_v30  ;;  %v331_v43 = vld [vmem:[%s1146_s5 + $0xb8] sm:$0xff]  ;;  %v275_v44 = vld [vmem:[%s1138_s7 + $0xc0] sm:$0xff] }
  0x51   : > { %552 = vst [vmem:[%s1179_s25 + $0x48] sm:$0xff] %v495_v13  ;;  %v1234_v45 = vld [vmem:[%s1146_s5 + $0xc0] sm:$0xff]  ;;  %v500_v46 = vadd.f32 %v443_v27, %v322_v0  ;;  %v447_v47 = vmul.f32 %v1149_v4, %v383_v35  ;;  %v386_v48 = vsub.f32 %v272_v31, %v329_v32  ;;  %v276_v49 = vld [vmem:[%s1138_s7 + $0xc8] sm:$0xff]  ;;  %v1240_v50 = vld [vmem:[%s1146_s5 + $0xc8] sm:$0xff]  ;;  %v501_v51 = vadd.f32 %v444_v28, %v323_v2 }
  0x52   : > { %553 = vst [vmem:[%s1179_s25 + $0x50] sm:$0xff] %v496_v20  ;;  %v448_v52 = vmul.f32 %v1153_v7, %v384_v36  ;;  %v387_v53 = vsub.f32 %v273_v37, %v330_v38  ;;  %v388_v54 = vsub.f32 %v274_v39, %v331_v43  ;;  %v277_v55 = vld [vmem:[%s1138_s7 + $0xd0] sm:$0xff]  ;;  %v334_v56 = vld [vmem:[%s1146_s5 + $0xd0] sm:$0xff]  ;;  %v502_v57 = vadd.f32 %v445_v34, %v324_v11  ;;  %v278_v60 = vld [vmem:[%s1138_s7 + $0xd8] sm:$0xff] }
  0x53   : > { %554 = vst [vmem:[%s1179_s25 + $0x58] sm:$0xff] %v497_v26  ;;  %v449_v58 = vmul.f32 %v1156_v9, %v385_v42  ;;  %v389_v59 = vsub.f32 %v275_v44, %v1234_v45  ;;  %v335_v61 = vld [vmem:[%s1146_s5 + $0xd8] sm:$0xff]  ;;  %v503_v62 = vadd.f32 %v446_v41, %v325_v17  ;;  %v450_v63 = vmul.f32 %v1149_v4, %v386_v48  ;;  %v279_v1 = vld [vmem:[%s1138_s7 + $0xe0] sm:$0xff]  ;;  %v336_v2 = vld [vmem:[%s1146_s5 + $0xe0] sm:$0xff] }
  0x54   : > { %555 = vst [vmem:[%s1179_s25 + $0x60] sm:$0xff] %v498_v33  ;;  %v390_v0 = vsub.f32 %v276_v49, %v1240_v50  ;;  %v504_v3 = vadd.f32 %v447_v47, %v326_v19  ;;  %v451_v5 = vmul.f32 %v1153_v7, %v387_v53  ;;  %v391_v6 = vsub.f32 %v277_v55, %v334_v56  ;;  %v280_v8 = vld [vmem:[%s1138_s7 + $0xe8] sm:$0xff]  ;;  %v337_v10 = vld [vmem:[%s1146_s5 + $0xe8] sm:$0xff]  ;;  %v281_v14 = vld [vmem:[%s1138_s7 + $0xf0] sm:$0xff] }
  0x55   : > { %556 = vst [vmem:[%s1179_s25 + $0x68] sm:$0xff] %v499_v40  ;;  %v505_v11 = vadd.f32 %v448_v52, %v327_v24  ;;  %v452_v12 = vmul.f32 %v1156_v9, %v388_v54  ;;  %v392_v13 = vsub.f32 %v278_v60, %v335_v61  ;;  %v338_v15 = vld [vmem:[%s1146_s5 + $0xf0] sm:$0xff]  ;;  %v506_v16 = vadd.f32 %v449_v58, %v328_v30  ;;  %v282_v19 = vld [vmem:[%s1138_s7 + $0xf8] sm:$0xff]  ;;  %v339_v20 = vld [vmem:[%s1146_s5 + $0xf8] sm:$0xff] }
  0x56   : > { %557 = vst [vmem:[%s1179_s25 + $0x70] sm:$0xff] %v500_v46  ;;  %v453_v17 = vmul.f32 %v1149_v4, %v389_v59  ;;  %v393_v18 = vsub.f32 %v279_v1, %v336_v2  ;;  %v507_v21 = vadd.f32 %v450_v63, %v329_v32  ;;  %v454_v22 = vmul.f32 %v1153_v7, %v390_v0  ;;  %v283_v24 = vld [vmem:[%s1138_s7 + $0x100] sm:$0xff]  ;;  %v340_v25 = vld [vmem:[%s1146_s5 + $0x100] sm:$0xff]  ;;  %v284_v29 = vld [vmem:[%s1138_s7 + $0x108] sm:$0xff] }
  0x57   : > { %558 = vst [vmem:[%s1179_s25 + $0x78] sm:$0xff] %v501_v51  ;;  %v394_v23 = vsub.f32 %v280_v8, %v337_v10  ;;  %v508_v26 = vadd.f32 %v451_v5, %v330_v38  ;;  %v455_v27 = vmul.f32 %v1156_v9, %v391_v6  ;;  %v395_v28 = vsub.f32 %v281_v14, %v338_v15  ;;  %v341_v30 = vld [vmem:[%s1146_s5 + $0x108] sm:$0xff]  ;;  %v285_v34 = vld [vmem:[%s1138_s7 + $0x110] sm:$0xff]  ;;  %v342_v35 = vld [vmem:[%s1146_s5 + $0x110] sm:$0xff] }
  0x58   : > { %559 = vst [vmem:[%s1179_s25 + $0x80] sm:$0xff] %v502_v57  ;;  %v509_v31 = vadd.f32 %v452_v12, %v331_v43  ;;  %v456_v32 = vmul.f32 %v1149_v4, %v392_v13  ;;  %v396_v33 = vsub.f32 %v282_v19, %v339_v20  ;;  %v510_v36 = vadd.f32 %v453_v17, %v1234_v45  ;;  %v286_v39 = vld [vmem:[%s1138_s7 + $0x118] sm:$0xff]  ;;  %v343_v40 = vld [vmem:[%s1146_s5 + $0x118] sm:$0xff]  ;;  %v287_v44 = vld [vmem:[%s1138_s7 + $0x120] sm:$0xff] }
  0x59   : > { %560 = vst [vmem:[%s1179_s25 + $0x88] sm:$0xff] %v503_v62  ;;  %v457_v37 = vmul.f32 %v1153_v7, %v393_v18  ;;  %v397_v38 = vsub.f32 %v283_v24, %v340_v25  ;;  %v511_v41 = vadd.f32 %v454_v22, %v1240_v50  ;;  %v458_v42 = vmul.f32 %v1156_v9, %v394_v23  ;;  %v344_v46 = vld [vmem:[%s1146_s5 + $0x120] sm:$0xff]  ;;  %v288_v49 = vld [vmem:[%s1138_s7 + $0x128] sm:$0xff]  ;;  %v345_v51 = vld [vmem:[%s1146_s5 + $0x128] sm:$0xff] }
  0x5a   : > { %561 = vst [vmem:[%s1179_s25 + $0x90] sm:$0xff] %v504_v3  ;;  %v398_v43 = vsub.f32 %v284_v29, %v341_v30  ;;  %v512_v45 = vadd.f32 %v455_v27, %v334_v56  ;;  %v459_v47 = vmul.f32 %v1149_v4, %v395_v28  ;;  %v399_v48 = vsub.f32 %v285_v34, %v342_v35  ;;  %v289_v54 = vld [vmem:[%s1138_s7 + $0x130] sm:$0xff]  ;;  %v346_v55 = vld [vmem:[%s1146_s5 + $0x130] sm:$0xff]  ;;  %v290_v59 = vld [vmem:[%s1138_s7 + $0x138] sm:$0xff] }
  0x5b   : > { %562 = vst [vmem:[%s1179_s25 + $0x98] sm:$0xff] %v505_v11  ;;  %v513_v50 = vadd.f32 %v456_v32, %v335_v61  ;;  %v460_v52 = vmul.f32 %v1153_v7, %v396_v33  ;;  %v400_v53 = vsub.f32 %v286_v39, %v343_v40  ;;  %v514_v56 = vadd.f32 %v457_v37, %v336_v2  ;;  %v347_v60 = vld [vmem:[%s1146_s5 + $0x138] sm:$0xff]  ;;  %v291_v0 = vld [vmem:[%s1138_s7 + $0x140] sm:$0xff]  ;;  %v348_v1 = vld [vmem:[%s1146_s5 + $0x140] sm:$0xff] }
  0x5c   : > { %563 = vst [vmem:[%s1179_s25 + $0xa0] sm:$0xff] %v506_v16  ;;  %v461_v57 = vmul.f32 %v1156_v9, %v397_v38  ;;  %v401_v58 = vsub.f32 %v287_v44, %v344_v46  ;;  %v515_v61 = vadd.f32 %v458_v42, %v337_v10  ;;  %v462_v62 = vmul.f32 %v1149_v4, %v398_v43  ;;  %v292_v6 = vld [vmem:[%s1138_s7 + $0x148] sm:$0xff]  ;;  %v349_v8 = vld [vmem:[%s1146_s5 + $0x148] sm:$0xff]  ;;  %v293_v13 = vld [vmem:[%s1138_s7 + $0x150] sm:$0xff] }
  0x5d   : > { %564 = vst [vmem:[%s1179_s25 + $0xa8] sm:$0xff] %v507_v21  ;;  %v402_v63 = vsub.f32 %v288_v49, %v345_v51  ;;  %v516_v2 = vadd.f32 %v459_v47, %v338_v15  ;;  %v463_v3 = vmul.f32 %v1153_v7, %v399_v48  ;;  %v403_v5 = vsub.f32 %v289_v54, %v346_v55  ;;  %v350_v14 = vld [vmem:[%s1146_s5 + $0x150] sm:$0xff]  ;;  %v294_v18 = vld [vmem:[%s1138_s7 + $0x158] sm:$0xff]  ;;  %v351_v19 = vld [vmem:[%s1146_s5 + $0x158] sm:$0xff] }
  0x5e   : > { %565 = vst [vmem:[%s1179_s25 + $0xb0] sm:$0xff] %v508_v26  ;;  %v517_v10 = vadd.f32 %v460_v52, %v339_v20  ;;  %v464_v11 = vmul.f32 %v1156_v9, %v400_v53  ;;  %v404_v12 = vsub.f32 %v290_v59, %v347_v60  ;;  %v518_v15 = vadd.f32 %v461_v57, %v340_v25  ;;  %v295_v23 = vld [vmem:[%s1138_s7 + $0x160] sm:$0xff]  ;;  %v352_v24 = vld [vmem:[%s1146_s5 + $0x160] sm:$0xff]  ;;  %v296_v28 = vld [vmem:[%s1138_s7 + $0x168] sm:$0xff] }
  0x5f   : > { %566 = vst [vmem:[%s1179_s25 + $0xb8] sm:$0xff] %v509_v31  ;;  %v465_v16 = vmul.f32 %v1149_v4, %v401_v58  ;;  %v405_v17 = vsub.f32 %v291_v0, %v348_v1  ;;  %v519_v20 = vadd.f32 %v462_v62, %v341_v30  ;;  %v466_v21 = vmul.f32 %v1153_v7, %v402_v63  ;;  %v353_v29 = vld [vmem:[%s1146_s5 + $0x168] sm:$0xff]  ;;  %v297_v33 = vld [vmem:[%s1138_s7 + $0x170] sm:$0xff]  ;;  %v354_v34 = vld [vmem:[%s1146_s5 + $0x170] sm:$0xff] }
  0x60   : > { %567 = vst [vmem:[%s1179_s25 + $0xc0] sm:$0xff] %v510_v36  ;;  %v406_v22 = vsub.f32 %v292_v6, %v349_v8  ;;  %v520_v25 = vadd.f32 %v463_v3, %v342_v35  ;;  %v467_v26 = vmul.f32 %v1156_v9, %v403_v5  ;;  %v407_v27 = vsub.f32 %v293_v13, %v350_v14  ;;  %v298_v38 = vld [vmem:[%s1138_s7 + $0x178] sm:$0xff]  ;;  %v355_v39 = vld [vmem:[%s1146_s5 + $0x178] sm:$0xff]  ;;  %v299_v43 = vld [vmem:[%s1138_s7 + $0x180] sm:$0xff] }
  0x61   : > { %568 = vst [vmem:[%s1179_s25 + $0xc8] sm:$0xff] %v511_v41  ;;  %v521_v30 = vadd.f32 %v464_v11, %v343_v40  ;;  %v468_v31 = vmul.f32 %v1149_v4, %v404_v12  ;;  %v408_v32 = vsub.f32 %v294_v18, %v351_v19  ;;  %v522_v35 = vadd.f32 %v465_v16, %v344_v46  ;;  %v356_v44 = vld [vmem:[%s1146_s5 + $0x180] sm:$0xff]  ;;  %v300_v48 = vld [vmem:[%s1138_s7 + $0x188] sm:$0xff]  ;;  %v357_v49 = vld [vmem:[%s1146_s5 + $0x188] sm:$0xff] }
  0x62   : > { %569 = vst [vmem:[%s1179_s25 + $0xd0] sm:$0xff] %v512_v45  ;;  %v469_v36 = vmul.f32 %v1153_v7, %v405_v17  ;;  %v409_v37 = vsub.f32 %v295_v23, %v352_v24  ;;  %v523_v40 = vadd.f32 %v466_v21, %v345_v51  ;;  %v470_v41 = vmul.f32 %v1156_v9, %v406_v22  ;;  %v301_v53 = vld [vmem:[%s1138_s7 + $0x190] sm:$0xff]  ;;  %v358_v54 = vld [vmem:[%s1146_s5 + $0x190] sm:$0xff]  ;;  %v302_v58 = vld [vmem:[%s1138_s7 + $0x198] sm:$0xff] }
  0x63   : > { %570 = vst [vmem:[%s1179_s25 + $0xd8] sm:$0xff] %v513_v50  ;;  %v410_v42 = vsub.f32 %v296_v28, %v353_v29  ;;  %v524_v46 = vadd.f32 %v467_v26, %v346_v55  ;;  %v471_v45 = vmul.f32 %v1149_v4, %v407_v27  ;;  %v411_v47 = vsub.f32 %v297_v33, %v354_v34  ;;  %v359_v59 = vld [vmem:[%s1146_s5 + $0x198] sm:$0xff]  ;;  %v303_v63 = vld [vmem:[%s1138_s7 + $0x1a0] sm:$0xff]  ;;  %v360_v0 = vld [vmem:[%s1146_s5 + $0x1a0] sm:$0xff] }
  0x64   : > { %571 = vst [vmem:[%s1179_s25 + $0xe0] sm:$0xff] %v514_v56  ;;  %v525_v51 = vadd.f32 %v468_v31, %v347_v60  ;;  %v472_v50 = vmul.f32 %v1153_v7, %v408_v32  ;;  %v412_v52 = vsub.f32 %v298_v38, %v355_v39  ;;  %v526_v55 = vadd.f32 %v469_v36, %v348_v1  ;;  %v304_v5 = vld [vmem:[%s1138_s7 + $0x1a8] sm:$0xff]  ;;  %v361_v6 = vld [vmem:[%s1146_s5 + $0x1a8] sm:$0xff]  ;;  %v305_v12 = vld [vmem:[%s1138_s7 + $0x1b0] sm:$0xff] }
  0x65   : > { %572 = vst [vmem:[%s1179_s25 + $0xe8] sm:$0xff] %v515_v61  ;;  %v473_v56 = vmul.f32 %v1156_v9, %v409_v37  ;;  %v413_v57 = vsub.f32 %v299_v43, %v356_v44  ;;  %v527_v60 = vadd.f32 %v470_v41, %v349_v8  ;;  %v474_v61 = vmul.f32 %v1149_v4, %v410_v42  ;;  %v362_v13 = vld [vmem:[%s1146_s5 + $0x1b0] sm:$0xff]  ;;  %v306_v17 = vld [vmem:[%s1138_s7 + $0x1b8] sm:$0xff]  ;;  %v363_v18 = vld [vmem:[%s1146_s5 + $0x1b8] sm:$0xff] }
  0x66   : > { %573 = vst [vmem:[%s1179_s25 + $0xf0] sm:$0xff] %v516_v2  ;;  %v414_v62 = vsub.f32 %v300_v48, %v357_v49  ;;  %v528_v1 = vadd.f32 %v471_v45, %v350_v14  ;;  %v475_v2 = vmul.f32 %v1153_v7, %v411_v47  ;;  %v415_v3 = vsub.f32 %v301_v53, %v358_v54  ;;  %v307_v22 = vld [vmem:[%s1138_s7 + $0x1c0] sm:$0xff]  ;;  %v364_v23 = vld [vmem:[%s1146_s5 + $0x1c0] sm:$0xff] }
  0x67   : > { %574 = vst [vmem:[%s1179_s25 + $0xf8] sm:$0xff] %v517_v10  ;;  %v529_v8 = vadd.f32 %v472_v50, %v351_v19  ;;  %v476_v10 = vmul.f32 %v1156_v9, %v412_v52  ;;  %v416_v11 = vsub.f32 %v302_v58, %v359_v59  ;;  %v530_v14 = vadd.f32 %v473_v56, %v352_v24 }
  0x68   : > { %575 = vst [vmem:[%s1179_s25 + $0x100] sm:$0xff] %v518_v15  ;;  %v477_v15 = vmul.f32 %v1149_v4, %v413_v57  ;;  %v417_v16 = vsub.f32 %v303_v63, %v360_v0  ;;  %v478_v19 = vmul.f32 %v1153_v7, %v414_v62  ;;  %v418_v21 = vsub.f32 %v304_v5, %v361_v6 }
  0x69   : > { %576 = vst [vmem:[%s1179_s25 + $0x108] sm:$0xff] %v519_v20  ;;  %v531_v20 = vadd.f32 %v474_v61, %v353_v29  ;;  %v479_v24 = vmul.f32 %v1156_v9, %v415_v3  ;;  %v419_v26 = vsub.f32 %v305_v12, %v362_v13  ;;  %v533_v27 = vadd.f32 %v476_v10, %v355_v39 }
  0x6a   : > { %577 = vst [vmem:[%s1179_s25 + $0x110] sm:$0xff] %v520_v25  ;;  %v532_v25 = vadd.f32 %v475_v2, %v354_v34  ;;  %v480_v28 = vmul.f32 %v1149_v4, %v416_v11  ;;  %v420_v29 = vsub.f32 %v306_v17, %v363_v18  ;;  %v481_v31 = vmul.f32 %v1153_v7, %v417_v16 }
  0x6b   : > { %578 = vst [vmem:[%s1179_s25 + $0x118] sm:$0xff] %v521_v30  ;;  %v534_v30 = vadd.f32 %v477_v15, %v356_v44  ;;  %v421_v32 = vsub.f32 %v307_v22, %v364_v23  ;;  %v535_v33 = vadd.f32 %v478_v19, %v357_v49  ;;  %v482_v34 = vmul.f32 %v1156_v9, %v418_v21 }
  0x6c   : > { %579 = vst [vmem:[%s1179_s25 + $0x120] sm:$0xff] %v522_v35  ;;  %v536_v35 = vadd.f32 %v479_v24, %v358_v54  ;;  %v483_v36 = vmul.f32 %v1149_v4, %v419_v26  ;;  %v537_v37 = vadd.f32 %v480_v28, %v359_v59  ;;  %v484_v38 = vmul.f32 %v1153_v7, %v420_v29 }
  0x6d   : > { %580 = vst [vmem:[%s1179_s25 + $0x128] sm:$0xff] %v523_v40  ;;  %v538_v39 = vadd.f32 %v481_v31, %v360_v0  ;;  %v485_v40 = vmul.f32 %v1156_v9, %v421_v32  ;;  %v539_v4 = vadd.f32 %v482_v34, %v361_v6 }
  0x6e   : > { %581 = vst [vmem:[%s1179_s25 + $0x130] sm:$0xff] %v524_v46  ;;  %v540_v41 = vadd.f32 %v483_v36, %v362_v13  ;;  %v541_v7 = vadd.f32 %v484_v38, %v363_v18 }
  0x6f   : > { %582 = vst [vmem:[%s1179_s25 + $0x138] sm:$0xff] %v525_v51  ;;  %v542_v42 = vadd.f32 %v485_v40, %v364_v23 }
  0x70   : > { %583 = vst [vmem:[%s1179_s25 + $0x140] sm:$0xff] %v526_v55 }
  0x71   : > { %584 = vst [vmem:[%s1179_s25 + $0x148] sm:$0xff] %v527_v60 }
  0x72   : > { %585 = vst [vmem:[%s1179_s25 + $0x150] sm:$0xff] %v528_v1 }
  0x73   : > { %586 = vst [vmem:[%s1179_s25 + $0x158] sm:$0xff] %v529_v8 }
  0x74   : > { %587 = vst [vmem:[%s1179_s25 + $0x160] sm:$0xff] %v530_v14 }
  0x75   : > { %588 = vst [vmem:[%s1179_s25 + $0x168] sm:$0xff] %v531_v20 }
  0x76   : > { %589 = vst [vmem:[%s1179_s25 + $0x170] sm:$0xff] %v532_v25 }
  0x77   : > { %590 = vst [vmem:[%s1179_s25 + $0x178] sm:$0xff] %v533_v27 }
  0x78   : > { %591 = vst [vmem:[%s1179_s25 + $0x180] sm:$0xff] %v534_v30 }
  0x79   : > { %592 = vst [vmem:[%s1179_s25 + $0x188] sm:$0xff] %v535_v33 }
  0x7a   : > { %593 = vst [vmem:[%s1179_s25 + $0x190] sm:$0xff] %v536_v35 }
  0x7b   : > { %594 = vst [vmem:[%s1179_s25 + $0x198] sm:$0xff] %v537_v37 }
  0x7c   : > { %595 = vst [vmem:[%s1179_s25 + $0x1a0] sm:$0xff] %v538_v39 }
  0x7d   : > { %596 = vst [vmem:[%s1179_s25 + $0x1a8] sm:$0xff] %v539_v4 }
  0x7e   : > { %597 = vst [vmem:[%s1179_s25 + $0x1b0] sm:$0xff] %v540_v41 }
  0x7f   : > { %598 = vst [vmem:[%s1179_s25 + $0x1b8] sm:$0xff] %v541_v7 }
  0x80   : > { %599 = vst [vmem:[%s1179_s25 + $0x1c0] sm:$0xff] %v542_v42 }
  0x81   : > { %925 = shalt.err (!%p922_p7)
}
  0x82   : > { %s973_s23 = smov 384   ;;  %s974_s4 = smov 24  }
  0x83   : > { %747 = dma.vmem_to_hbm [thread:$0]  (%p1084_p11), %s615_s28, 7296, %s617_s29, %s601_s6, %s973_s23, %s973_s23, %s974_s4  }
  0x84 PF: > { %s631_s7 = sand.u32 1, %s956_s12   ;;  %p1443_p9 = scmp.ge.s32.totalorder %s968_s15, 2 }
  0x85   : > { %s632_s5 = scalar_lea.sflag [#allocation4], %s631_s7 }
  0x86   : > { %p761_p13 = pnand %p1443_p9, %p1088_p12 }
  0x88   : > { %p762_p0 = pneg %p761_p13 }
  0x8a   : > { %951 = dma.done.wait (%p762_p0), %s632_s5, 7296  }
  0x8b   : > { %953 = vsyncadd (%p762_p0), %s632_s5, 4294960000  ;;  %p17_p8 = scmp.ge.s32.totalorder %s1016_s16, 4   ;;  %s1444_s12 = smov %s960_s13 }
  0x8c   : > { %s1445_s13 = smov %s964_s14  ;;  %s1446_s14 = smov %s1027_s19 }
  0x8d   : > { %s1447_s15 = smov %s1016_s16  ;;  %19 = sbr.rel (!%p17_p8) target bundleno = 6 (0x6), region = 93 }
  0x92   :  { %638 = vsyncpa [#allocation3], 1 }
  0x93   :  { %640 = vsyncpa [#allocation3 + $0x1], 1 }
  0x94   :  { %641 = vsyncpa [#allocation6], 1 }
  0x95   :  { %643 = vsyncpa [#allocation6 + $0x1], 1 }
  0x96   :  { %644 = vsyncpa [#allocation4], 1 }
  0x97   :  { %646 = vsyncpa [#allocation4 + $0x1], 1 }

</bundles_post_ra>
